<compile_context>
chip_gen: v7x
topology: tpu7x:2x2x1
jax: 0.10.0
libtpu: 0.0.40
codegen_flags: <defaults>
</compile_context>

<pallas_src>
import functools

import jax
import jax.numpy as jnp
from jax.experimental import pallas as pl
from jax.experimental.pallas import tpu as pltpu


def _round_up(x: int, m: int) -> int:
    return (x + m - 1) // m * m


def bert_emb_kernel(wids_ref, pids_ref,          # SMEM scalar-prefetch: (N_pad,) int32 each
                    tt_ref,                       # VMEM (TN, 1) int32 token-type ids
                    ttab_ref,                     # VMEM (T, Hp) f32 token-type table (tiny)
                    wtab_hbm, ptab_hbm,           # HBM refs (V, Hp) / (P, Hp) f32
                    out_ref,                      # VMEM (TN, Hp) f32
                    wbuf, pbuf, sem):             # scratch: VMEM (TN,Hp) x2, DMA sem (2,)
    tn, hp = out_ref.shape
    base = pl.program_id(0) * tn
    unroll = tn <= 64

    # ---- issue one row-gather DMA per token for word and position embeddings ----
    @pl.loop(0, tn, unroll=unroll)
    def _start(i):
        w = wids_ref[base + i]
        p = pids_ref[base + i]
        pltpu.make_async_copy(wtab_hbm.at[pl.ds(w, 1), :],
                              wbuf.at[pl.ds(i, 1), :], sem.at[0]).start()
        pltpu.make_async_copy(ptab_hbm.at[pl.ds(p, 1), :],
                              pbuf.at[pl.ds(i, 1), :], sem.at[1]).start()

    # ---- wait for all row copies (same-sized descriptors, one wait per copy) ----
    @pl.loop(0, tn, unroll=unroll)
    def _wait(i):
        pltpu.make_async_copy(wtab_hbm.at[pl.ds(0, 1), :],
                              wbuf.at[pl.ds(i, 1), :], sem.at[0]).wait()
        pltpu.make_async_copy(ptab_hbm.at[pl.ds(0, 1), :],
                              pbuf.at[pl.ds(i, 1), :], sem.at[1]).wait()

    # ---- word + position rows, plus token-type embedding via VPU select ----
    emb = wbuf[...] + pbuf[...]
    tt = tt_ref[...]                              # (TN, 1) int32
    n_types = ttab_ref.shape[0]                   # static, tiny (e.g. 2)
    for t in range(n_types):
        row = ttab_ref[pl.ds(t, 1), :]            # (1, Hp)
        emb = emb + (tt == t).astype(jnp.float32) * row
    out_ref[...] = emb                            # dropout(eval) == identity


@functools.partial(jax.jit, static_argnames=("tile_tokens",))
def bert_embeddings_without_layernorm(input_ids, token_type_ids, position_ids,
                                      word_tab, type_tab, pos_tab,
                                      tile_tokens=None):
    B, S = input_ids.shape
    V, H = word_tab.shape
    T = type_tab.shape[0]
    P = pos_tab.shape[0]
    N = B * S

    if token_type_ids is None:
        token_type_ids = jnp.zeros((B, S), jnp.int32)
    if position_ids is None:
        position_ids = jnp.broadcast_to(jnp.arange(S, dtype=jnp.int32)[None, :], (B, S))

    # Lane-dense hidden: pad H up to a multiple of 128 (no-op for BERT-base H=768).
    Hp = _round_up(H, 128)
    if Hp != H:
        pad = ((0, 0), (0, Hp - H))
        word_tab = jnp.pad(word_tab, pad)
        type_tab = jnp.pad(type_tab, pad)
        pos_tab = jnp.pad(pos_tab, pad)

    # Token-tile size (multiple of 8 for the sublane constraint).
    if tile_tokens is None:
        tile_tokens = min(128, _round_up(N, 8))
    TN = _round_up(min(tile_tokens, _round_up(N, 8)), 8)
    N_pad = _round_up(N, TN)
    num_tiles = N_pad // TN

    # Clamp indices: the DMA gather has no OOB check on the VMEM/HBM path.
    wids = jnp.clip(input_ids.reshape(N).astype(jnp.int32), 0, V - 1)
    pids = jnp.clip(position_ids.reshape(N).astype(jnp.int32), 0, P - 1)
    tts = token_type_ids.reshape(N, 1).astype(jnp.int32)
    if N_pad != N:
        wids = jnp.pad(wids, (0, N_pad - N))
        pids = jnp.pad(pids, (0, N_pad - N))
        tts = jnp.pad(tts, ((0, N_pad - N), (0, 0)))

    grid_spec = pltpu.PrefetchScalarGridSpec(
        num_scalar_prefetch=2,                    # wids, pids -> SMEM
        grid=(num_tiles,),
        in_specs=[
            pl.BlockSpec((TN, 1), lambda i, wids, pids: (i, 0)),    # token-type ids (VMEM)
            pl.BlockSpec((T, Hp), lambda i, wids, pids: (0, 0)),    # tiny type table (VMEM)
            pl.BlockSpec(memory_space=pl.ANY),                      # word table (HBM)
            pl.BlockSpec(memory_space=pl.ANY),                      # position table (HBM)
        ],
        out_specs=pl.BlockSpec((TN, Hp), lambda i, wids, pids: (i, 0)),
        scratch_shapes=[
            pltpu.VMEM((TN, Hp), jnp.float32),    # gathered word rows
            pltpu.VMEM((TN, Hp), jnp.float32),    # gathered position rows
            pltpu.SemaphoreType.DMA((2,)),
        ],
    )

    out = pl.pallas_call(
        bert_emb_kernel,
        out_shape=jax.ShapeDtypeStruct((N_pad, Hp), jnp.float32),
        grid_spec=grid_spec,
        compiler_params=pltpu.CompilerParams(
            dimension_semantics=("parallel",),
            vmem_limit_bytes=32 * 1024 * 1024,
        ),
        cost_estimate=pl.CostEstimate(
            flops=2 * (T + 1) * N_pad * Hp,
            transcendentals=0,
            bytes_accessed=3 * N_pad * Hp * 4 + 3 * N_pad * 4 + T * Hp * 4,
        ),
    )(wids, pids, tts, type_tab, word_tab, pos_tab)

    return out[:N, :H].reshape(B, S, H)


if __name__ == "__main__":
    # Small config consistent with the module's __init__.
    vocab_size = 64
    hidden_size = 32
    max_position_embeddings = 16
    type_vocab_size = 2
    pad_token_id = 0
    B, S = 2, 8

    key = jax.random.PRNGKey(0)
    k_w, k_t, k_p, k_ids, k_tt = jax.random.split(key, 5)

    # Deterministic parameter init (like nn.Embedding weights, std=0.02).
    word_tab = 0.02 * jax.random.normal(k_w, (vocab_size, hidden_size), jnp.float32)
    word_tab = word_tab.at[pad_token_id].set(0.0)  # padding_idx row zero-initialized
    type_tab = 0.02 * jax.random.normal(k_t, (type_vocab_size, hidden_size), jnp.float32)
    pos_tab = 0.02 * jax.random.normal(k_p, (max_position_embeddings, hidden_size), jnp.float32)

    # Inputs: random token ids; random token types (exercise the select path);
    # default absolute position ids = arange(seq) broadcast over batch.
    input_ids = jax.random.randint(k_ids, (B, S), 0, vocab_size, jnp.int32)
    token_type_ids = jax.random.randint(k_tt, (B, S), 0, type_vocab_size, jnp.int32)
    position_ids = jnp.broadcast_to(jnp.arange(S, dtype=jnp.int32)[None, :], (B, S))

    out = bert_embeddings_without_layernorm(
        input_ids, token_type_ids, position_ids,
        word_tab, type_tab, pos_tab, tile_tokens=8)   # 2 grid steps on the toy shape
    out = jax.block_until_ready(out)

    # Reference check in plain JAX (gather semantics).
    ref = (jnp.take(word_tab, input_ids, axis=0)
           + jnp.take(type_tab, token_type_ids, axis=0)
           + jnp.take(pos_tab, position_ids, axis=0))
    assert out.shape == (B, S, hidden_size)
    assert jnp.allclose(out, ref, atol=1e-6), "mismatch vs reference"

    print("KERNEL_OK")
</pallas_src>

<mosaic_0001>
module attributes {stable_mosaic.version = 11 : i64} {
  func.func @bert_emb_kernel(%arg0: i32, %arg1: memref<16xi32, #tpu.memory_space<smem>>, %arg2: memref<16xi32, #tpu.memory_space<smem>>, %arg3: memref<8x1xi32, #tpu.memory_space<vmem>>, %arg4: memref<2x128xf32, #tpu.memory_space<vmem>>, %arg5: memref<64x128xf32, #tpu.memory_space<any>>, %arg6: memref<16x128xf32, #tpu.memory_space<any>>, %arg7: memref<8x128xf32, #tpu.memory_space<vmem>>, %arg8: memref<8x128xf32, #tpu.memory_space<vmem>>, %arg9: memref<8x128xf32, #tpu.memory_space<vmem>>, %arg10: memref<2x!tpu.dma_semaphore, #tpu.memory_space<semaphore_mem>>) attributes {dimension_semantics = [#tpu.dimension_semantics<parallel>], iteration_bounds = array<i64: 2>, scalar_prefetch = 2 : i64, scratch_operands = 3 : i64, tpu.core_type = #tpu.core_type<tc>, window_params = [{transform_indices = @transform_0, window_bounds = array<i64: 8, 1>}, {pipeline_mode = #tpu.pipeline_mode<synchronous>, transform_indices = @transform_1, window_bounds = array<i64: 2, 128>}, {}, {}, {transform_indices = @transform_4, window_bounds = array<i64: 8, 128>}]} {
    %c8_i32 = arith.constant 8 : i32
    %0 = arith.muli %arg0, %c8_i32 : i32
    %c0_i32 = arith.constant 0 : i32
    %c1_i32 = arith.constant 1 : i32
    %1 = arith.muli %c0_i32, %c1_i32 : i32
    %c0_i32_0 = arith.constant 0 : i32
    %2 = arith.addi %c0_i32_0, %1 : i32
    %3 = arith.addi %0, %2 : i32
    %4 = arith.index_cast %3 : i32 to index
    %5 = memref.load %arg1[%4] : memref<16xi32, #tpu.memory_space<smem>>
    %6 = arith.addi %0, %2 : i32
    %7 = arith.index_cast %6 : i32 to index
    %8 = memref.load %arg2[%7] : memref<16xi32, #tpu.memory_space<smem>>
    %c0_i32_1 = arith.constant 0 : i32
    %c0_i32_2 = arith.constant 0 : i32
    %9 = tpu.memref_slice %arg5[%5, %c0_i32_2] : memref<64x128xf32, #tpu.memory_space<any>> -> memref<1x128xf32, #tpu.memory_space<any>>
    %c0_i32_3 = arith.constant 0 : i32
    %10 = tpu.memref_slice %arg8[%2, %c0_i32_3] : memref<8x128xf32, #tpu.memory_space<vmem>> -> memref<1x128xf32, #tpu.memory_space<vmem>>
    %11 = tpu.memref_slice %arg10[%c0_i32_1] : memref<2x!tpu.dma_semaphore, #tpu.memory_space<semaphore_mem>> -> memref<1x!tpu.dma_semaphore, #tpu.memory_space<semaphore_mem>>
    %12 = tpu.memref_squeeze %11 : memref<1x!tpu.dma_semaphore, #tpu.memory_space<semaphore_mem>> -> memref<!tpu.dma_semaphore, #tpu.memory_space<semaphore_mem>>
    tpu.enqueue_dma source(%9 : memref<1x128xf32, #tpu.memory_space<any>>) target(%10 : memref<1x128xf32, #tpu.memory_space<vmem>>) target_semaphore(%12 : memref<!tpu.dma_semaphore, #tpu.memory_space<semaphore_mem>>)
    %c1_i32_4 = arith.constant 1 : i32
    %c0_i32_5 = arith.constant 0 : i32
    %13 = tpu.memref_slice %arg6[%8, %c0_i32_5] : memref<16x128xf32, #tpu.memory_space<any>> -> memref<1x128xf32, #tpu.memory_space<any>>
    %c0_i32_6 = arith.constant 0 : i32
    %14 = tpu.memref_slice %arg9[%2, %c0_i32_6] : memref<8x128xf32, #tpu.memory_space<vmem>> -> memref<1x128xf32, #tpu.memory_space<vmem>>
    %15 = tpu.memref_slice %arg10[%c1_i32_4] : memref<2x!tpu.dma_semaphore, #tpu.memory_space<semaphore_mem>> -> memref<1x!tpu.dma_semaphore, #tpu.memory_space<semaphore_mem>>
    %16 = tpu.memref_squeeze %15 : memref<1x!tpu.dma_semaphore, #tpu.memory_space<semaphore_mem>> -> memref<!tpu.dma_semaphore, #tpu.memory_space<semaphore_mem>>
    tpu.enqueue_dma source(%13 : memref<1x128xf32, #tpu.memory_space<any>>) target(%14 : memref<1x128xf32, #tpu.memory_space<vmem>>) target_semaphore(%16 : memref<!tpu.dma_semaphore, #tpu.memory_space<semaphore_mem>>)
    %c1_i32_7 = arith.constant 1 : i32
    %c1_i32_8 = arith.constant 1 : i32
    %17 = arith.muli %c1_i32_7, %c1_i32_8 : i32
    %c0_i32_9 = arith.constant 0 : i32
    %18 = arith.addi %c0_i32_9, %17 : i32
    %19 = arith.addi %0, %18 : i32
    %20 = arith.index_cast %19 : i32 to index
    %21 = memref.load %arg1[%20] : memref<16xi32, #tpu.memory_space<smem>>
    %22 = arith.addi %0, %18 : i32
    %23 = arith.index_cast %22 : i32 to index
    %24 = memref.load %arg2[%23] : memref<16xi32, #tpu.memory_space<smem>>
    %c0_i32_10 = arith.constant 0 : i32
    %c0_i32_11 = arith.constant 0 : i32
    %25 = tpu.memref_slice %arg5[%21, %c0_i32_11] : memref<64x128xf32, #tpu.memory_space<any>> -> memref<1x128xf32, #tpu.memory_space<any>>
    %c0_i32_12 = arith.constant 0 : i32
    %26 = tpu.memref_slice %arg8[%18, %c0_i32_12] : memref<8x128xf32, #tpu.memory_space<vmem>> -> memref<1x128xf32, #tpu.memory_space<vmem>>
    %27 = tpu.memref_slice %arg10[%c0_i32_10] : memref<2x!tpu.dma_semaphore, #tpu.memory_space<semaphore_mem>> -> memref<1x!tpu.dma_semaphore, #tpu.memory_space<semaphore_mem>>
    %28 = tpu.memref_squeeze %27 : memref<1x!tpu.dma_semaphore, #tpu.memory_space<semaphore_mem>> -> memref<!tpu.dma_semaphore, #tpu.memory_space<semaphore_mem>>
    tpu.enqueue_dma source(%25 : memref<1x128xf32, #tpu.memory_space<any>>) target(%26 : memref<1x128xf32, #tpu.memory_space<vmem>>) target_semaphore(%28 : memref<!tpu.dma_semaphore, #tpu.memory_space<semaphore_mem>>)
    %c1_i32_13 = arith.constant 1 : i32
    %c0_i32_14 = arith.constant 0 : i32
    %29 = tpu.memref_slice %arg6[%24, %c0_i32_14] : memref<16x128xf32, #tpu.memory_space<any>> -> memref<1x128xf32, #tpu.memory_space<any>>
    %c0_i32_15 = arith.constant 0 : i32
    %30 = tpu.memref_slice %arg9[%18, %c0_i32_15] : memref<8x128xf32, #tpu.memory_space<vmem>> -> memref<1x128xf32, #tpu.memory_space<vmem>>
    %31 = tpu.memref_slice %arg10[%c1_i32_13] : memref<2x!tpu.dma_semaphore, #tpu.memory_space<semaphore_mem>> -> memref<1x!tpu.dma_semaphore, #tpu.memory_space<semaphore_mem>>
    %32 = tpu.memref_squeeze %31 : memref<1x!tpu.dma_semaphore, #tpu.memory_space<semaphore_mem>> -> memref<!tpu.dma_semaphore, #tpu.memory_space<semaphore_mem>>
    tpu.enqueue_dma source(%29 : memref<1x128xf32, #tpu.memory_space<any>>) target(%30 : memref<1x128xf32, #tpu.memory_space<vmem>>) target_semaphore(%32 : memref<!tpu.dma_semaphore, #tpu.memory_space<semaphore_mem>>)
    %c2_i32 = arith.constant 2 : i32
    %c1_i32_16 = arith.constant 1 : i32
    %33 = arith.muli %c2_i32, %c1_i32_16 : i32
    %c0_i32_17 = arith.constant 0 : i32
    %34 = arith.addi %c0_i32_17, %33 : i32
    %35 = arith.addi %0, %34 : i32
    %36 = arith.index_cast %35 : i32 to index
    %37 = memref.load %arg1[%36] : memref<16xi32, #tpu.memory_space<smem>>
    %38 = arith.addi %0, %34 : i32
    %39 = arith.index_cast %38 : i32 to index
    %40 = memref.load %arg2[%39] : memref<16xi32, #tpu.memory_space<smem>>
    %c0_i32_18 = arith.constant 0 : i32
    %c0_i32_19 = arith.constant 0 : i32
    %41 = tpu.memref_slice %arg5[%37, %c0_i32_19] : memref<64x128xf32, #tpu.memory_space<any>> -> memref<1x128xf32, #tpu.memory_space<any>>
    %c0_i32_20 = arith.constant 0 : i32
    %42 = tpu.memref_slice %arg8[%34, %c0_i32_20] : memref<8x128xf32, #tpu.memory_space<vmem>> -> memref<1x128xf32, #tpu.memory_space<vmem>>
    %43 = tpu.memref_slice %arg10[%c0_i32_18] : memref<2x!tpu.dma_semaphore, #tpu.memory_space<semaphore_mem>> -> memref<1x!tpu.dma_semaphore, #tpu.memory_space<semaphore_mem>>
    %44 = tpu.memref_squeeze %43 : memref<1x!tpu.dma_semaphore, #tpu.memory_space<semaphore_mem>> -> memref<!tpu.dma_semaphore, #tpu.memory_space<semaphore_mem>>
    tpu.enqueue_dma source(%41 : memref<1x128xf32, #tpu.memory_space<any>>) target(%42 : memref<1x128xf32, #tpu.memory_space<vmem>>) target_semaphore(%44 : memref<!tpu.dma_semaphore, #tpu.memory_space<semaphore_mem>>)
    %c1_i32_21 = arith.constant 1 : i32
    %c0_i32_22 = arith.constant 0 : i32
    %45 = tpu.memref_slice %arg6[%40, %c0_i32_22] : memref<16x128xf32, #tpu.memory_space<any>> -> memref<1x128xf32, #tpu.memory_space<any>>
    %c0_i32_23 = arith.constant 0 : i32
    %46 = tpu.memref_slice %arg9[%34, %c0_i32_23] : memref<8x128xf32, #tpu.memory_space<vmem>> -> memref<1x128xf32, #tpu.memory_space<vmem>>
    %47 = tpu.memref_slice %arg10[%c1_i32_21] : memref<2x!tpu.dma_semaphore, #tpu.memory_space<semaphore_mem>> -> memref<1x!tpu.dma_semaphore, #tpu.memory_space<semaphore_mem>>
    %48 = tpu.memref_squeeze %47 : memref<1x!tpu.dma_semaphore, #tpu.memory_space<semaphore_mem>> -> memref<!tpu.dma_semaphore, #tpu.memory_space<semaphore_mem>>
    tpu.enqueue_dma source(%45 : memref<1x128xf32, #tpu.memory_space<any>>) target(%46 : memref<1x128xf32, #tpu.memory_space<vmem>>) target_semaphore(%48 : memref<!tpu.dma_semaphore, #tpu.memory_space<semaphore_mem>>)
    %c3_i32 = arith.constant 3 : i32
    %c1_i32_24 = arith.constant 1 : i32
    %49 = arith.muli %c3_i32, %c1_i32_24 : i32
    %c0_i32_25 = arith.constant 0 : i32
    %50 = arith.addi %c0_i32_25, %49 : i32
    %51 = arith.addi %0, %50 : i32
    %52 = arith.index_cast %51 : i32 to index
    %53 = memref.load %arg1[%52] : memref<16xi32, #tpu.memory_space<smem>>
    %54 = arith.addi %0, %50 : i32
    %55 = arith.index_cast %54 : i32 to index
    %56 = memref.load %arg2[%55] : memref<16xi32, #tpu.memory_space<smem>>
    %c0_i32_26 = arith.constant 0 : i32
    %c0_i32_27 = arith.constant 0 : i32
    %57 = tpu.memref_slice %arg5[%53, %c0_i32_27] : memref<64x128xf32, #tpu.memory_space<any>> -> memref<1x128xf32, #tpu.memory_space<any>>
    %c0_i32_28 = arith.constant 0 : i32
    %58 = tpu.memref_slice %arg8[%50, %c0_i32_28] : memref<8x128xf32, #tpu.memory_space<vmem>> -> memref<1x128xf32, #tpu.memory_space<vmem>>
    %59 = tpu.memref_slice %arg10[%c0_i32_26] : memref<2x!tpu.dma_semaphore, #tpu.memory_space<semaphore_mem>> -> memref<1x!tpu.dma_semaphore, #tpu.memory_space<semaphore_mem>>
    %60 = tpu.memref_squeeze %59 : memref<1x!tpu.dma_semaphore, #tpu.memory_space<semaphore_mem>> -> memref<!tpu.dma_semaphore, #tpu.memory_space<semaphore_mem>>
    tpu.enqueue_dma source(%57 : memref<1x128xf32, #tpu.memory_space<any>>) target(%58 : memref<1x128xf32, #tpu.memory_space<vmem>>) target_semaphore(%60 : memref<!tpu.dma_semaphore, #tpu.memory_space<semaphore_mem>>)
    %c1_i32_29 = arith.constant 1 : i32
    %c0_i32_30 = arith.constant 0 : i32
    %61 = tpu.memref_slice %arg6[%56, %c0_i32_30] : memref<16x128xf32, #tpu.memory_space<any>> -> memref<1x128xf32, #tpu.memory_space<any>>
    %c0_i32_31 = arith.constant 0 : i32
    %62 = tpu.memref_slice %arg9[%50, %c0_i32_31] : memref<8x128xf32, #tpu.memory_space<vmem>> -> memref<1x128xf32, #tpu.memory_space<vmem>>
    %63 = tpu.memref_slice %arg10[%c1_i32_29] : memref<2x!tpu.dma_semaphore, #tpu.memory_space<semaphore_mem>> -> memref<1x!tpu.dma_semaphore, #tpu.memory_space<semaphore_mem>>
    %64 = tpu.memref_squeeze %63 : memref<1x!tpu.dma_semaphore, #tpu.memory_space<semaphore_mem>> -> memref<!tpu.dma_semaphore, #tpu.memory_space<semaphore_mem>>
    tpu.enqueue_dma source(%61 : memref<1x128xf32, #tpu.memory_space<any>>) target(%62 : memref<1x128xf32, #tpu.memory_space<vmem>>) target_semaphore(%64 : memref<!tpu.dma_semaphore, #tpu.memory_space<semaphore_mem>>)
    %c4_i32 = arith.constant 4 : i32
    %c1_i32_32 = arith.constant 1 : i32
    %65 = arith.muli %c4_i32, %c1_i32_32 : i32
    %c0_i32_33 = arith.constant 0 : i32
    %66 = arith.addi %c0_i32_33, %65 : i32
    %67 = arith.addi %0, %66 : i32
    %68 = arith.index_cast %67 : i32 to index
    %69 = memref.load %arg1[%68] : memref<16xi32, #tpu.memory_space<smem>>
    %70 = arith.addi %0, %66 : i32
    %71 = arith.index_cast %70 : i32 to index
    %72 = memref.load %arg2[%71] : memref<16xi32, #tpu.memory_space<smem>>
    %c0_i32_34 = arith.constant 0 : i32
    %c0_i32_35 = arith.constant 0 : i32
    %73 = tpu.memref_slice %arg5[%69, %c0_i32_35] : memref<64x128xf32, #tpu.memory_space<any>> -> memref<1x128xf32, #tpu.memory_space<any>>
    %c0_i32_36 = arith.constant 0 : i32
    %74 = tpu.memref_slice %arg8[%66, %c0_i32_36] : memref<8x128xf32, #tpu.memory_space<vmem>> -> memref<1x128xf32, #tpu.memory_space<vmem>>
    %75 = tpu.memref_slice %arg10[%c0_i32_34] : memref<2x!tpu.dma_semaphore, #tpu.memory_space<semaphore_mem>> -> memref<1x!tpu.dma_semaphore, #tpu.memory_space<semaphore_mem>>
    %76 = tpu.memref_squeeze %75 : memref<1x!tpu.dma_semaphore, #tpu.memory_space<semaphore_mem>> -> memref<!tpu.dma_semaphore, #tpu.memory_space<semaphore_mem>>
    tpu.enqueue_dma source(%73 : memref<1x128xf32, #tpu.memory_space<any>>) target(%74 : memref<1x128xf32, #tpu.memory_space<vmem>>) target_semaphore(%76 : memref<!tpu.dma_semaphore, #tpu.memory_space<semaphore_mem>>)
    %c1_i32_37 = arith.constant 1 : i32
    %c0_i32_38 = arith.constant 0 : i32
    %77 = tpu.memref_slice %arg6[%72, %c0_i32_38] : memref<16x128xf32, #tpu.memory_space<any>> -> memref<1x128xf32, #tpu.memory_space<any>>
    %c0_i32_39 = arith.constant 0 : i32
    %78 = tpu.memref_slice %arg9[%66, %c0_i32_39] : memref<8x128xf32, #tpu.memory_space<vmem>> -> memref<1x128xf32, #tpu.memory_space<vmem>>
    %79 = tpu.memref_slice %arg10[%c1_i32_37] : memref<2x!tpu.dma_semaphore, #tpu.memory_space<semaphore_mem>> -> memref<1x!tpu.dma_semaphore, #tpu.memory_space<semaphore_mem>>
    %80 = tpu.memref_squeeze %79 : memref<1x!tpu.dma_semaphore, #tpu.memory_space<semaphore_mem>> -> memref<!tpu.dma_semaphore, #tpu.memory_space<semaphore_mem>>
    tpu.enqueue_dma source(%77 : memref<1x128xf32, #tpu.memory_space<any>>) target(%78 : memref<1x128xf32, #tpu.memory_space<vmem>>) target_semaphore(%80 : memref<!tpu.dma_semaphore, #tpu.memory_space<semaphore_mem>>)
    %c5_i32 = arith.constant 5 : i32
    %c1_i32_40 = arith.constant 1 : i32
    %81 = arith.muli %c5_i32, %c1_i32_40 : i32
    %c0_i32_41 = arith.constant 0 : i32
    %82 = arith.addi %c0_i32_41, %81 : i32
    %83 = arith.addi %0, %82 : i32
    %84 = arith.index_cast %83 : i32 to index
    %85 = memref.load %arg1[%84] : memref<16xi32, #tpu.memory_space<smem>>
    %86 = arith.addi %0, %82 : i32
    %87 = arith.index_cast %86 : i32 to index
    %88 = memref.load %arg2[%87] : memref<16xi32, #tpu.memory_space<smem>>
    %c0_i32_42 = arith.constant 0 : i32
    %c0_i32_43 = arith.constant 0 : i32
    %89 = tpu.memref_slice %arg5[%85, %c0_i32_43] : memref<64x128xf32, #tpu.memory_space<any>> -> memref<1x128xf32, #tpu.memory_space<any>>
    %c0_i32_44 = arith.constant 0 : i32
    %90 = tpu.memref_slice %arg8[%82, %c0_i32_44] : memref<8x128xf32, #tpu.memory_space<vmem>> -> memref<1x128xf32, #tpu.memory_space<vmem>>
    %91 = tpu.memref_slice %arg10[%c0_i32_42] : memref<2x!tpu.dma_semaphore, #tpu.memory_space<semaphore_mem>> -> memref<1x!tpu.dma_semaphore, #tpu.memory_space<semaphore_mem>>
    %92 = tpu.memref_squeeze %91 : memref<1x!tpu.dma_semaphore, #tpu.memory_space<semaphore_mem>> -> memref<!tpu.dma_semaphore, #tpu.memory_space<semaphore_mem>>
    tpu.enqueue_dma source(%89 : memref<1x128xf32, #tpu.memory_space<any>>) target(%90 : memref<1x128xf32, #tpu.memory_space<vmem>>) target_semaphore(%92 : memref<!tpu.dma_semaphore, #tpu.memory_space<semaphore_mem>>)
    %c1_i32_45 = arith.constant 1 : i32
    %c0_i32_46 = arith.constant 0 : i32
    %93 = tpu.memref_slice %arg6[%88, %c0_i32_46] : memref<16x128xf32, #tpu.memory_space<any>> -> memref<1x128xf32, #tpu.memory_space<any>>
    %c0_i32_47 = arith.constant 0 : i32
    %94 = tpu.memref_slice %arg9[%82, %c0_i32_47] : memref<8x128xf32, #tpu.memory_space<vmem>> -> memref<1x128xf32, #tpu.memory_space<vmem>>
    %95 = tpu.memref_slice %arg10[%c1_i32_45] : memref<2x!tpu.dma_semaphore, #tpu.memory_space<semaphore_mem>> -> memref<1x!tpu.dma_semaphore, #tpu.memory_space<semaphore_mem>>
    %96 = tpu.memref_squeeze %95 : memref<1x!tpu.dma_semaphore, #tpu.memory_space<semaphore_mem>> -> memref<!tpu.dma_semaphore, #tpu.memory_space<semaphore_mem>>
    tpu.enqueue_dma source(%93 : memref<1x128xf32, #tpu.memory_space<any>>) target(%94 : memref<1x128xf32, #tpu.memory_space<vmem>>) target_semaphore(%96 : memref<!tpu.dma_semaphore, #tpu.memory_space<semaphore_mem>>)
    %c6_i32 = arith.constant 6 : i32
    %c1_i32_48 = arith.constant 1 : i32
    %97 = arith.muli %c6_i32, %c1_i32_48 : i32
    %c0_i32_49 = arith.constant 0 : i32
    %98 = arith.addi %c0_i32_49, %97 : i32
    %99 = arith.addi %0, %98 : i32
    %100 = arith.index_cast %99 : i32 to index
    %101 = memref.load %arg1[%100] : memref<16xi32, #tpu.memory_space<smem>>
    %102 = arith.addi %0, %98 : i32
    %103 = arith.index_cast %102 : i32 to index
    %104 = memref.load %arg2[%103] : memref<16xi32, #tpu.memory_space<smem>>
    %c0_i32_50 = arith.constant 0 : i32
    %c0_i32_51 = arith.constant 0 : i32
    %105 = tpu.memref_slice %arg5[%101, %c0_i32_51] : memref<64x128xf32, #tpu.memory_space<any>> -> memref<1x128xf32, #tpu.memory_space<any>>
    %c0_i32_52 = arith.constant 0 : i32
    %106 = tpu.memref_slice %arg8[%98, %c0_i32_52] : memref<8x128xf32, #tpu.memory_space<vmem>> -> memref<1x128xf32, #tpu.memory_space<vmem>>
    %107 = tpu.memref_slice %arg10[%c0_i32_50] : memref<2x!tpu.dma_semaphore, #tpu.memory_space<semaphore_mem>> -> memref<1x!tpu.dma_semaphore, #tpu.memory_space<semaphore_mem>>
    %108 = tpu.memref_squeeze %107 : memref<1x!tpu.dma_semaphore, #tpu.memory_space<semaphore_mem>> -> memref<!tpu.dma_semaphore, #tpu.memory_space<semaphore_mem>>
    tpu.enqueue_dma source(%105 : memref<1x128xf32, #tpu.memory_space<any>>) target(%106 : memref<1x128xf32, #tpu.memory_space<vmem>>) target_semaphore(%108 : memref<!tpu.dma_semaphore, #tpu.memory_space<semaphore_mem>>)
    %c1_i32_53 = arith.constant 1 : i32
    %c0_i32_54 = arith.constant 0 : i32
    %109 = tpu.memref_slice %arg6[%104, %c0_i32_54] : memref<16x128xf32, #tpu.memory_space<any>> -> memref<1x128xf32, #tpu.memory_space<any>>
    %c0_i32_55 = arith.constant 0 : i32
    %110 = tpu.memref_slice %arg9[%98, %c0_i32_55] : memref<8x128xf32, #tpu.memory_space<vmem>> -> memref<1x128xf32, #tpu.memory_space<vmem>>
    %111 = tpu.memref_slice %arg10[%c1_i32_53] : memref<2x!tpu.dma_semaphore, #tpu.memory_space<semaphore_mem>> -> memref<1x!tpu.dma_semaphore, #tpu.memory_space<semaphore_mem>>
    %112 = tpu.memref_squeeze %111 : memref<1x!tpu.dma_semaphore, #tpu.memory_space<semaphore_mem>> -> memref<!tpu.dma_semaphore, #tpu.memory_space<semaphore_mem>>
    tpu.enqueue_dma source(%109 : memref<1x128xf32, #tpu.memory_space<any>>) target(%110 : memref<1x128xf32, #tpu.memory_space<vmem>>) target_semaphore(%112 : memref<!tpu.dma_semaphore, #tpu.memory_space<semaphore_mem>>)
    %c7_i32 = arith.constant 7 : i32
    %c1_i32_56 = arith.constant 1 : i32
    %113 = arith.muli %c7_i32, %c1_i32_56 : i32
    %c0_i32_57 = arith.constant 0 : i32
    %114 = arith.addi %c0_i32_57, %113 : i32
    %115 = arith.addi %0, %114 : i32
    %116 = arith.index_cast %115 : i32 to index
    %117 = memref.load %arg1[%116] : memref<16xi32, #tpu.memory_space<smem>>
    %118 = arith.addi %0, %114 : i32
    %119 = arith.index_cast %118 : i32 to index
    %120 = memref.load %arg2[%119] : memref<16xi32, #tpu.memory_space<smem>>
    %c0_i32_58 = arith.constant 0 : i32
    %c0_i32_59 = arith.constant 0 : i32
    %121 = tpu.memref_slice %arg5[%117, %c0_i32_59] : memref<64x128xf32, #tpu.memory_space<any>> -> memref<1x128xf32, #tpu.memory_space<any>>
    %c0_i32_60 = arith.constant 0 : i32
    %122 = tpu.memref_slice %arg8[%114, %c0_i32_60] : memref<8x128xf32, #tpu.memory_space<vmem>> -> memref<1x128xf32, #tpu.memory_space<vmem>>
    %123 = tpu.memref_slice %arg10[%c0_i32_58] : memref<2x!tpu.dma_semaphore, #tpu.memory_space<semaphore_mem>> -> memref<1x!tpu.dma_semaphore, #tpu.memory_space<semaphore_mem>>
    %124 = tpu.memref_squeeze %123 : memref<1x!tpu.dma_semaphore, #tpu.memory_space<semaphore_mem>> -> memref<!tpu.dma_semaphore, #tpu.memory_space<semaphore_mem>>
    tpu.enqueue_dma source(%121 : memref<1x128xf32, #tpu.memory_space<any>>) target(%122 : memref<1x128xf32, #tpu.memory_space<vmem>>) target_semaphore(%124 : memref<!tpu.dma_semaphore, #tpu.memory_space<semaphore_mem>>)
    %c1_i32_61 = arith.constant 1 : i32
    %c0_i32_62 = arith.constant 0 : i32
    %125 = tpu.memref_slice %arg6[%120, %c0_i32_62] : memref<16x128xf32, #tpu.memory_space<any>> -> memref<1x128xf32, #tpu.memory_space<any>>
    %c0_i32_63 = arith.constant 0 : i32
    %126 = tpu.memref_slice %arg9[%114, %c0_i32_63] : memref<8x128xf32, #tpu.memory_space<vmem>> -> memref<1x128xf32, #tpu.memory_space<vmem>>
    %127 = tpu.memref_slice %arg10[%c1_i32_61] : memref<2x!tpu.dma_semaphore, #tpu.memory_space<semaphore_mem>> -> memref<1x!tpu.dma_semaphore, #tpu.memory_space<semaphore_mem>>
    %128 = tpu.memref_squeeze %127 : memref<1x!tpu.dma_semaphore, #tpu.memory_space<semaphore_mem>> -> memref<!tpu.dma_semaphore, #tpu.memory_space<semaphore_mem>>
    tpu.enqueue_dma source(%125 : memref<1x128xf32, #tpu.memory_space<any>>) target(%126 : memref<1x128xf32, #tpu.memory_space<vmem>>) target_semaphore(%128 : memref<!tpu.dma_semaphore, #tpu.memory_space<semaphore_mem>>)
    %c8_i32_64 = arith.constant 8 : i32
    %c0_i32_65 = arith.constant 0 : i32
    %c1_i32_66 = arith.constant 1 : i32
    %129 = arith.muli %c0_i32_65, %c1_i32_66 : i32
    %c0_i32_67 = arith.constant 0 : i32
    %130 = arith.addi %c0_i32_67, %129 : i32
    %c0_i32_68 = arith.constant 0 : i32
    %c0_i32_69 = arith.constant 0 : i32
    %c0_i32_70 = arith.constant 0 : i32
    %131 = tpu.memref_slice %arg5[%c0_i32_69, %c0_i32_70] : memref<64x128xf32, #tpu.memory_space<any>> -> memref<1x128xf32, #tpu.memory_space<any>>
    %c0_i32_71 = arith.constant 0 : i32
    %132 = tpu.memref_slice %arg8[%130, %c0_i32_71] : memref<8x128xf32, #tpu.memory_space<vmem>> -> memref<1x128xf32, #tpu.memory_space<vmem>>
    %133 = tpu.memref_slice %arg10[%c0_i32_68] : memref<2x!tpu.dma_semaphore, #tpu.memory_space<semaphore_mem>> -> memref<1x!tpu.dma_semaphore, #tpu.memory_space<semaphore_mem>>
    %134 = tpu.memref_squeeze %133 : memref<1x!tpu.dma_semaphore, #tpu.memory_space<semaphore_mem>> -> memref<!tpu.dma_semaphore, #tpu.memory_space<semaphore_mem>>
    tpu.wait_dma2 semaphore(%134 : memref<!tpu.dma_semaphore, #tpu.memory_space<semaphore_mem>>) src(%131 : memref<1x128xf32, #tpu.memory_space<any>>) dst(%132 : memref<1x128xf32, #tpu.memory_space<vmem>>)
    %c1_i32_72 = arith.constant 1 : i32
    %c0_i32_73 = arith.constant 0 : i32
    %c0_i32_74 = arith.constant 0 : i32
    %135 = tpu.memref_slice %arg6[%c0_i32_73, %c0_i32_74] : memref<16x128xf32, #tpu.memory_space<any>> -> memref<1x128xf32, #tpu.memory_space<any>>
    %c0_i32_75 = arith.constant 0 : i32
    %136 = tpu.memref_slice %arg9[%130, %c0_i32_75] : memref<8x128xf32, #tpu.memory_space<vmem>> -> memref<1x128xf32, #tpu.memory_space<vmem>>
    %137 = tpu.memref_slice %arg10[%c1_i32_72] : memref<2x!tpu.dma_semaphore, #tpu.memory_space<semaphore_mem>> -> memref<1x!tpu.dma_semaphore, #tpu.memory_space<semaphore_mem>>
    %138 = tpu.memref_squeeze %137 : memref<1x!tpu.dma_semaphore, #tpu.memory_space<semaphore_mem>> -> memref<!tpu.dma_semaphore, #tpu.memory_space<semaphore_mem>>
    tpu.wait_dma2 semaphore(%138 : memref<!tpu.dma_semaphore, #tpu.memory_space<semaphore_mem>>) src(%135 : memref<1x128xf32, #tpu.memory_space<any>>) dst(%136 : memref<1x128xf32, #tpu.memory_space<vmem>>)
    %c1_i32_76 = arith.constant 1 : i32
    %c1_i32_77 = arith.constant 1 : i32
    %139 = arith.muli %c1_i32_76, %c1_i32_77 : i32
    %c0_i32_78 = arith.constant 0 : i32
    %140 = arith.addi %c0_i32_78, %139 : i32
    %c0_i32_79 = arith.constant 0 : i32
    %c0_i32_80 = arith.constant 0 : i32
    %c0_i32_81 = arith.constant 0 : i32
    %141 = tpu.memref_slice %arg5[%c0_i32_80, %c0_i32_81] : memref<64x128xf32, #tpu.memory_space<any>> -> memref<1x128xf32, #tpu.memory_space<any>>
    %c0_i32_82 = arith.constant 0 : i32
    %142 = tpu.memref_slice %arg8[%140, %c0_i32_82] : memref<8x128xf32, #tpu.memory_space<vmem>> -> memref<1x128xf32, #tpu.memory_space<vmem>>
    %143 = tpu.memref_slice %arg10[%c0_i32_79] : memref<2x!tpu.dma_semaphore, #tpu.memory_space<semaphore_mem>> -> memref<1x!tpu.dma_semaphore, #tpu.memory_space<semaphore_mem>>
    %144 = tpu.memref_squeeze %143 : memref<1x!tpu.dma_semaphore, #tpu.memory_space<semaphore_mem>> -> memref<!tpu.dma_semaphore, #tpu.memory_space<semaphore_mem>>
    tpu.wait_dma2 semaphore(%144 : memref<!tpu.dma_semaphore, #tpu.memory_space<semaphore_mem>>) src(%141 : memref<1x128xf32, #tpu.memory_space<any>>) dst(%142 : memref<1x128xf32, #tpu.memory_space<vmem>>)
    %c1_i32_83 = arith.constant 1 : i32
    %c0_i32_84 = arith.constant 0 : i32
    %c0_i32_85 = arith.constant 0 : i32
    %145 = tpu.memref_slice %arg6[%c0_i32_84, %c0_i32_85] : memref<16x128xf32, #tpu.memory_space<any>> -> memref<1x128xf32, #tpu.memory_space<any>>
    %c0_i32_86 = arith.constant 0 : i32
    %146 = tpu.memref_slice %arg9[%140, %c0_i32_86] : memref<8x128xf32, #tpu.memory_space<vmem>> -> memref<1x128xf32, #tpu.memory_space<vmem>>
    %147 = tpu.memref_slice %arg10[%c1_i32_83] : memref<2x!tpu.dma_semaphore, #tpu.memory_space<semaphore_mem>> -> memref<1x!tpu.dma_semaphore, #tpu.memory_space<semaphore_mem>>
    %148 = tpu.memref_squeeze %147 : memref<1x!tpu.dma_semaphore, #tpu.memory_space<semaphore_mem>> -> memref<!tpu.dma_semaphore, #tpu.memory_space<semaphore_mem>>
    tpu.wait_dma2 semaphore(%148 : memref<!tpu.dma_semaphore, #tpu.memory_space<semaphore_mem>>) src(%145 : memref<1x128xf32, #tpu.memory_space<any>>) dst(%146 : memref<1x128xf32, #tpu.memory_space<vmem>>)
    %c2_i32_87 = arith.constant 2 : i32
    %c1_i32_88 = arith.constant 1 : i32
    %149 = arith.muli %c2_i32_87, %c1_i32_88 : i32
    %c0_i32_89 = arith.constant 0 : i32
    %150 = arith.addi %c0_i32_89, %149 : i32
    %c0_i32_90 = arith.constant 0 : i32
    %c0_i32_91 = arith.constant 0 : i32
    %c0_i32_92 = arith.constant 0 : i32
    %151 = tpu.memref_slice %arg5[%c0_i32_91, %c0_i32_92] : memref<64x128xf32, #tpu.memory_space<any>> -> memref<1x128xf32, #tpu.memory_space<any>>
    %c0_i32_93 = arith.constant 0 : i32
    %152 = tpu.memref_slice %arg8[%150, %c0_i32_93] : memref<8x128xf32, #tpu.memory_space<vmem>> -> memref<1x128xf32, #tpu.memory_space<vmem>>
    %153 = tpu.memref_slice %arg10[%c0_i32_90] : memref<2x!tpu.dma_semaphore, #tpu.memory_space<semaphore_mem>> -> memref<1x!tpu.dma_semaphore, #tpu.memory_space<semaphore_mem>>
    %154 = tpu.memref_squeeze %153 : memref<1x!tpu.dma_semaphore, #tpu.memory_space<semaphore_mem>> -> memref<!tpu.dma_semaphore, #tpu.memory_space<semaphore_mem>>
    tpu.wait_dma2 semaphore(%154 : memref<!tpu.dma_semaphore, #tpu.memory_space<semaphore_mem>>) src(%151 : memref<1x128xf32, #tpu.memory_space<any>>) dst(%152 : memref<1x128xf32, #tpu.memory_space<vmem>>)
    %c1_i32_94 = arith.constant 1 : i32
    %c0_i32_95 = arith.constant 0 : i32
    %c0_i32_96 = arith.constant 0 : i32
    %155 = tpu.memref_slice %arg6[%c0_i32_95, %c0_i32_96] : memref<16x128xf32, #tpu.memory_space<any>> -> memref<1x128xf32, #tpu.memory_space<any>>
    %c0_i32_97 = arith.constant 0 : i32
    %156 = tpu.memref_slice %arg9[%150, %c0_i32_97] : memref<8x128xf32, #tpu.memory_space<vmem>> -> memref<1x128xf32, #tpu.memory_space<vmem>>
    %157 = tpu.memref_slice %arg10[%c1_i32_94] : memref<2x!tpu.dma_semaphore, #tpu.memory_space<semaphore_mem>> -> memref<1x!tpu.dma_semaphore, #tpu.memory_space<semaphore_mem>>
    %158 = tpu.memref_squeeze %157 : memref<1x!tpu.dma_semaphore, #tpu.memory_space<semaphore_mem>> -> memref<!tpu.dma_semaphore, #tpu.memory_space<semaphore_mem>>
    tpu.wait_dma2 semaphore(%158 : memref<!tpu.dma_semaphore, #tpu.memory_space<semaphore_mem>>) src(%155 : memref<1x128xf32, #tpu.memory_space<any>>) dst(%156 : memref<1x128xf32, #tpu.memory_space<vmem>>)
    %c3_i32_98 = arith.constant 3 : i32
    %c1_i32_99 = arith.constant 1 : i32
    %159 = arith.muli %c3_i32_98, %c1_i32_99 : i32
    %c0_i32_100 = arith.constant 0 : i32
    %160 = arith.addi %c0_i32_100, %159 : i32
    %c0_i32_101 = arith.constant 0 : i32
    %c0_i32_102 = arith.constant 0 : i32
    %c0_i32_103 = arith.constant 0 : i32
    %161 = tpu.memref_slice %arg5[%c0_i32_102, %c0_i32_103] : memref<64x128xf32, #tpu.memory_space<any>> -> memref<1x128xf32, #tpu.memory_space<any>>
    %c0_i32_104 = arith.constant 0 : i32
    %162 = tpu.memref_slice %arg8[%160, %c0_i32_104] : memref<8x128xf32, #tpu.memory_space<vmem>> -> memref<1x128xf32, #tpu.memory_space<vmem>>
    %163 = tpu.memref_slice %arg10[%c0_i32_101] : memref<2x!tpu.dma_semaphore, #tpu.memory_space<semaphore_mem>> -> memref<1x!tpu.dma_semaphore, #tpu.memory_space<semaphore_mem>>
    %164 = tpu.memref_squeeze %163 : memref<1x!tpu.dma_semaphore, #tpu.memory_space<semaphore_mem>> -> memref<!tpu.dma_semaphore, #tpu.memory_space<semaphore_mem>>
    tpu.wait_dma2 semaphore(%164 : memref<!tpu.dma_semaphore, #tpu.memory_space<semaphore_mem>>) src(%161 : memref<1x128xf32, #tpu.memory_space<any>>) dst(%162 : memref<1x128xf32, #tpu.memory_space<vmem>>)
    %c1_i32_105 = arith.constant 1 : i32
    %c0_i32_106 = arith.constant 0 : i32
    %c0_i32_107 = arith.constant 0 : i32
    %165 = tpu.memref_slice %arg6[%c0_i32_106, %c0_i32_107] : memref<16x128xf32, #tpu.memory_space<any>> -> memref<1x128xf32, #tpu.memory_space<any>>
    %c0_i32_108 = arith.constant 0 : i32
    %166 = tpu.memref_slice %arg9[%160, %c0_i32_108] : memref<8x128xf32, #tpu.memory_space<vmem>> -> memref<1x128xf32, #tpu.memory_space<vmem>>
    %167 = tpu.memref_slice %arg10[%c1_i32_105] : memref<2x!tpu.dma_semaphore, #tpu.memory_space<semaphore_mem>> -> memref<1x!tpu.dma_semaphore, #tpu.memory_space<semaphore_mem>>
    %168 = tpu.memref_squeeze %167 : memref<1x!tpu.dma_semaphore, #tpu.memory_space<semaphore_mem>> -> memref<!tpu.dma_semaphore, #tpu.memory_space<semaphore_mem>>
    tpu.wait_dma2 semaphore(%168 : memref<!tpu.dma_semaphore, #tpu.memory_space<semaphore_mem>>) src(%165 : memref<1x128xf32, #tpu.memory_space<any>>) dst(%166 : memref<1x128xf32, #tpu.memory_space<vmem>>)
    %c4_i32_109 = arith.constant 4 : i32
    %c1_i32_110 = arith.constant 1 : i32
    %169 = arith.muli %c4_i32_109, %c1_i32_110 : i32
    %c0_i32_111 = arith.constant 0 : i32
    %170 = arith.addi %c0_i32_111, %169 : i32
    %c0_i32_112 = arith.constant 0 : i32
    %c0_i32_113 = arith.constant 0 : i32
    %c0_i32_114 = arith.constant 0 : i32
    %171 = tpu.memref_slice %arg5[%c0_i32_113, %c0_i32_114] : memref<64x128xf32, #tpu.memory_space<any>> -> memref<1x128xf32, #tpu.memory_space<any>>
    %c0_i32_115 = arith.constant 0 : i32
    %172 = tpu.memref_slice %arg8[%170, %c0_i32_115] : memref<8x128xf32, #tpu.memory_space<vmem>> -> memref<1x128xf32, #tpu.memory_space<vmem>>
    %173 = tpu.memref_slice %arg10[%c0_i32_112] : memref<2x!tpu.dma_semaphore, #tpu.memory_space<semaphore_mem>> -> memref<1x!tpu.dma_semaphore, #tpu.memory_space<semaphore_mem>>
    %174 = tpu.memref_squeeze %173 : memref<1x!tpu.dma_semaphore, #tpu.memory_space<semaphore_mem>> -> memref<!tpu.dma_semaphore, #tpu.memory_space<semaphore_mem>>
    tpu.wait_dma2 semaphore(%174 : memref<!tpu.dma_semaphore, #tpu.memory_space<semaphore_mem>>) src(%171 : memref<1x128xf32, #tpu.memory_space<any>>) dst(%172 : memref<1x128xf32, #tpu.memory_space<vmem>>)
    %c1_i32_116 = arith.constant 1 : i32
    %c0_i32_117 = arith.constant 0 : i32
    %c0_i32_118 = arith.constant 0 : i32
    %175 = tpu.memref_slice %arg6[%c0_i32_117, %c0_i32_118] : memref<16x128xf32, #tpu.memory_space<any>> -> memref<1x128xf32, #tpu.memory_space<any>>
    %c0_i32_119 = arith.constant 0 : i32
    %176 = tpu.memref_slice %arg9[%170, %c0_i32_119] : memref<8x128xf32, #tpu.memory_space<vmem>> -> memref<1x128xf32, #tpu.memory_space<vmem>>
    %177 = tpu.memref_slice %arg10[%c1_i32_116] : memref<2x!tpu.dma_semaphore, #tpu.memory_space<semaphore_mem>> -> memref<1x!tpu.dma_semaphore, #tpu.memory_space<semaphore_mem>>
    %178 = tpu.memref_squeeze %177 : memref<1x!tpu.dma_semaphore, #tpu.memory_space<semaphore_mem>> -> memref<!tpu.dma_semaphore, #tpu.memory_space<semaphore_mem>>
    tpu.wait_dma2 semaphore(%178 : memref<!tpu.dma_semaphore, #tpu.memory_space<semaphore_mem>>) src(%175 : memref<1x128xf32, #tpu.memory_space<any>>) dst(%176 : memref<1x128xf32, #tpu.memory_space<vmem>>)
    %c5_i32_120 = arith.constant 5 : i32
    %c1_i32_121 = arith.constant 1 : i32
    %179 = arith.muli %c5_i32_120, %c1_i32_121 : i32
    %c0_i32_122 = arith.constant 0 : i32
    %180 = arith.addi %c0_i32_122, %179 : i32
    %c0_i32_123 = arith.constant 0 : i32
    %c0_i32_124 = arith.constant 0 : i32
    %c0_i32_125 = arith.constant 0 : i32
    %181 = tpu.memref_slice %arg5[%c0_i32_124, %c0_i32_125] : memref<64x128xf32, #tpu.memory_space<any>> -> memref<1x128xf32, #tpu.memory_space<any>>
    %c0_i32_126 = arith.constant 0 : i32
    %182 = tpu.memref_slice %arg8[%180, %c0_i32_126] : memref<8x128xf32, #tpu.memory_space<vmem>> -> memref<1x128xf32, #tpu.memory_space<vmem>>
    %183 = tpu.memref_slice %arg10[%c0_i32_123] : memref<2x!tpu.dma_semaphore, #tpu.memory_space<semaphore_mem>> -> memref<1x!tpu.dma_semaphore, #tpu.memory_space<semaphore_mem>>
    %184 = tpu.memref_squeeze %183 : memref<1x!tpu.dma_semaphore, #tpu.memory_space<semaphore_mem>> -> memref<!tpu.dma_semaphore, #tpu.memory_space<semaphore_mem>>
    tpu.wait_dma2 semaphore(%184 : memref<!tpu.dma_semaphore, #tpu.memory_space<semaphore_mem>>) src(%181 : memref<1x128xf32, #tpu.memory_space<any>>) dst(%182 : memref<1x128xf32, #tpu.memory_space<vmem>>)
    %c1_i32_127 = arith.constant 1 : i32
    %c0_i32_128 = arith.constant 0 : i32
    %c0_i32_129 = arith.constant 0 : i32
    %185 = tpu.memref_slice %arg6[%c0_i32_128, %c0_i32_129] : memref<16x128xf32, #tpu.memory_space<any>> -> memref<1x128xf32, #tpu.memory_space<any>>
    %c0_i32_130 = arith.constant 0 : i32
    %186 = tpu.memref_slice %arg9[%180, %c0_i32_130] : memref<8x128xf32, #tpu.memory_space<vmem>> -> memref<1x128xf32, #tpu.memory_space<vmem>>
    %187 = tpu.memref_slice %arg10[%c1_i32_127] : memref<2x!tpu.dma_semaphore, #tpu.memory_space<semaphore_mem>> -> memref<1x!tpu.dma_semaphore, #tpu.memory_space<semaphore_mem>>
    %188 = tpu.memref_squeeze %187 : memref<1x!tpu.dma_semaphore, #tpu.memory_space<semaphore_mem>> -> memref<!tpu.dma_semaphore, #tpu.memory_space<semaphore_mem>>
    tpu.wait_dma2 semaphore(%188 : memref<!tpu.dma_semaphore, #tpu.memory_space<semaphore_mem>>) src(%185 : memref<1x128xf32, #tpu.memory_space<any>>) dst(%186 : memref<1x128xf32, #tpu.memory_space<vmem>>)
    %c6_i32_131 = arith.constant 6 : i32
    %c1_i32_132 = arith.constant 1 : i32
    %189 = arith.muli %c6_i32_131, %c1_i32_132 : i32
    %c0_i32_133 = arith.constant 0 : i32
    %190 = arith.addi %c0_i32_133, %189 : i32
    %c0_i32_134 = arith.constant 0 : i32
    %c0_i32_135 = arith.constant 0 : i32
    %c0_i32_136 = arith.constant 0 : i32
    %191 = tpu.memref_slice %arg5[%c0_i32_135, %c0_i32_136] : memref<64x128xf32, #tpu.memory_space<any>> -> memref<1x128xf32, #tpu.memory_space<any>>
    %c0_i32_137 = arith.constant 0 : i32
    %192 = tpu.memref_slice %arg8[%190, %c0_i32_137] : memref<8x128xf32, #tpu.memory_space<vmem>> -> memref<1x128xf32, #tpu.memory_space<vmem>>
    %193 = tpu.memref_slice %arg10[%c0_i32_134] : memref<2x!tpu.dma_semaphore, #tpu.memory_space<semaphore_mem>> -> memref<1x!tpu.dma_semaphore, #tpu.memory_space<semaphore_mem>>
    %194 = tpu.memref_squeeze %193 : memref<1x!tpu.dma_semaphore, #tpu.memory_space<semaphore_mem>> -> memref<!tpu.dma_semaphore, #tpu.memory_space<semaphore_mem>>
    tpu.wait_dma2 semaphore(%194 : memref<!tpu.dma_semaphore, #tpu.memory_space<semaphore_mem>>) src(%191 : memref<1x128xf32, #tpu.memory_space<any>>) dst(%192 : memref<1x128xf32, #tpu.memory_space<vmem>>)
    %c1_i32_138 = arith.constant 1 : i32
    %c0_i32_139 = arith.constant 0 : i32
    %c0_i32_140 = arith.constant 0 : i32
    %195 = tpu.memref_slice %arg6[%c0_i32_139, %c0_i32_140] : memref<16x128xf32, #tpu.memory_space<any>> -> memref<1x128xf32, #tpu.memory_space<any>>
    %c0_i32_141 = arith.constant 0 : i32
    %196 = tpu.memref_slice %arg9[%190, %c0_i32_141] : memref<8x128xf32, #tpu.memory_space<vmem>> -> memref<1x128xf32, #tpu.memory_space<vmem>>
    %197 = tpu.memref_slice %arg10[%c1_i32_138] : memref<2x!tpu.dma_semaphore, #tpu.memory_space<semaphore_mem>> -> memref<1x!tpu.dma_semaphore, #tpu.memory_space<semaphore_mem>>
    %198 = tpu.memref_squeeze %197 : memref<1x!tpu.dma_semaphore, #tpu.memory_space<semaphore_mem>> -> memref<!tpu.dma_semaphore, #tpu.memory_space<semaphore_mem>>
    tpu.wait_dma2 semaphore(%198 : memref<!tpu.dma_semaphore, #tpu.memory_space<semaphore_mem>>) src(%195 : memref<1x128xf32, #tpu.memory_space<any>>) dst(%196 : memref<1x128xf32, #tpu.memory_space<vmem>>)
    %c7_i32_142 = arith.constant 7 : i32
    %c1_i32_143 = arith.constant 1 : i32
    %199 = arith.muli %c7_i32_142, %c1_i32_143 : i32
    %c0_i32_144 = arith.constant 0 : i32
    %200 = arith.addi %c0_i32_144, %199 : i32
    %c0_i32_145 = arith.constant 0 : i32
    %c0_i32_146 = arith.constant 0 : i32
    %c0_i32_147 = arith.constant 0 : i32
    %201 = tpu.memref_slice %arg5[%c0_i32_146, %c0_i32_147] : memref<64x128xf32, #tpu.memory_space<any>> -> memref<1x128xf32, #tpu.memory_space<any>>
    %c0_i32_148 = arith.constant 0 : i32
    %202 = tpu.memref_slice %arg8[%200, %c0_i32_148] : memref<8x128xf32, #tpu.memory_space<vmem>> -> memref<1x128xf32, #tpu.memory_space<vmem>>
    %203 = tpu.memref_slice %arg10[%c0_i32_145] : memref<2x!tpu.dma_semaphore, #tpu.memory_space<semaphore_mem>> -> memref<1x!tpu.dma_semaphore, #tpu.memory_space<semaphore_mem>>
    %204 = tpu.memref_squeeze %203 : memref<1x!tpu.dma_semaphore, #tpu.memory_space<semaphore_mem>> -> memref<!tpu.dma_semaphore, #tpu.memory_space<semaphore_mem>>
    tpu.wait_dma2 semaphore(%204 : memref<!tpu.dma_semaphore, #tpu.memory_space<semaphore_mem>>) src(%201 : memref<1x128xf32, #tpu.memory_space<any>>) dst(%202 : memref<1x128xf32, #tpu.memory_space<vmem>>)
    %c1_i32_149 = arith.constant 1 : i32
    %c0_i32_150 = arith.constant 0 : i32
    %c0_i32_151 = arith.constant 0 : i32
    %205 = tpu.memref_slice %arg6[%c0_i32_150, %c0_i32_151] : memref<16x128xf32, #tpu.memory_space<any>> -> memref<1x128xf32, #tpu.memory_space<any>>
    %c0_i32_152 = arith.constant 0 : i32
    %206 = tpu.memref_slice %arg9[%200, %c0_i32_152] : memref<8x128xf32, #tpu.memory_space<vmem>> -> memref<1x128xf32, #tpu.memory_space<vmem>>
    %207 = tpu.memref_slice %arg10[%c1_i32_149] : memref<2x!tpu.dma_semaphore, #tpu.memory_space<semaphore_mem>> -> memref<1x!tpu.dma_semaphore, #tpu.memory_space<semaphore_mem>>
    %208 = tpu.memref_squeeze %207 : memref<1x!tpu.dma_semaphore, #tpu.memory_space<semaphore_mem>> -> memref<!tpu.dma_semaphore, #tpu.memory_space<semaphore_mem>>
    tpu.wait_dma2 semaphore(%208 : memref<!tpu.dma_semaphore, #tpu.memory_space<semaphore_mem>>) src(%205 : memref<1x128xf32, #tpu.memory_space<any>>) dst(%206 : memref<1x128xf32, #tpu.memory_space<vmem>>)
    %c8_i32_153 = arith.constant 8 : i32
    %c0 = arith.constant 0 : index
    %c0_154 = arith.constant 0 : index
    %209 = vector.load %arg8[%c0, %c0_154] : memref<8x128xf32, #tpu.memory_space<vmem>>, vector<8x128xf32>
    %c0_155 = arith.constant 0 : index
    %c0_156 = arith.constant 0 : index
    %210 = vector.load %arg9[%c0_155, %c0_156] : memref<8x128xf32, #tpu.memory_space<vmem>>, vector<8x128xf32>
    %211 = arith.addf %209, %210 : vector<8x128xf32>
    %c0_157 = arith.constant 0 : index
    %c0_158 = arith.constant 0 : index
    %212 = vector.load %arg3[%c0_157, %c0_158] : memref<8x1xi32, #tpu.memory_space<vmem>>, vector<8x1xi32>
    %c0_159 = arith.constant 0 : index
    %c0_160 = arith.constant 0 : index
    %213 = vector.load %arg4[%c0_159, %c0_160] : memref<2x128xf32, #tpu.memory_space<vmem>>, vector<1x128xf32>
    %c0_i32_161 = arith.constant 0 : i32
    %214 = vector.broadcast %c0_i32_161 : i32 to vector<8x1xi32>
    %215 = arith.cmpi eq, %212, %214 : vector<8x1xi32>
    %216 = arith.extui %215 : vector<8x1xi1> to vector<8x1xi32>
    %217 = arith.sitofp %216 : vector<8x1xi32> to vector<8x1xf32>
    %218 = vector.broadcast %217 : vector<8x1xf32> to vector<8x128xf32>
    %219 = vector.broadcast %213 : vector<1x128xf32> to vector<8x128xf32>
    %220 = arith.mulf %218, %219 : vector<8x128xf32>
    %221 = arith.addf %211, %220 : vector<8x128xf32>
    %c1 = arith.constant 1 : index
    %c0_162 = arith.constant 0 : index
    %222 = vector.load %arg4[%c1, %c0_162] : memref<2x128xf32, #tpu.memory_space<vmem>>, vector<1x128xf32>
    %c1_i32_163 = arith.constant 1 : i32
    %223 = vector.broadcast %c1_i32_163 : i32 to vector<8x1xi32>
    %224 = arith.cmpi eq, %212, %223 : vector<8x1xi32>
    %225 = arith.extui %224 : vector<8x1xi1> to vector<8x1xi32>
    %226 = arith.sitofp %225 : vector<8x1xi32> to vector<8x1xf32>
    %227 = vector.broadcast %226 : vector<8x1xf32> to vector<8x128xf32>
    %228 = vector.broadcast %222 : vector<1x128xf32> to vector<8x128xf32>
    %229 = arith.mulf %227, %228 : vector<8x128xf32>
    %230 = arith.addf %221, %229 : vector<8x128xf32>
    %c0_164 = arith.constant 0 : index
    %c0_165 = arith.constant 0 : index
    %231 = vector.load %arg7[%c0_164, %c0_165] : memref<8x128xf32, #tpu.memory_space<vmem>>, vector<8x128xf32>
    tpu.vector_store %arg7[%c0_164, %c0_165], %230 {strides = array<i32>} : memref<8x128xf32, #tpu.memory_space<vmem>>, vector<8x128xf32>,
    return
  }
  func.func @transform_0(%arg0: i32, %arg1: memref<16xi32, #tpu.memory_space<smem>>, %arg2: memref<16xi32, #tpu.memory_space<smem>>) -> (i32, i32) {
    %c0_i32 = arith.constant 0 : i32
    %c0_i32_0 = arith.constant 0 : i32
    return %arg0, %c0_i32 : i32, i32
  }
  func.func @transform_1(%arg0: i32, %arg1: memref<16xi32, #tpu.memory_space<smem>>, %arg2: memref<16xi32, #tpu.memory_space<smem>>) -> (i32, i32) {
    %c0_i32 = arith.constant 0 : i32
    %c0_i32_0 = arith.constant 0 : i32
    %c0_i32_1 = arith.constant 0 : i32
    return %c0_i32, %c0_i32_0 : i32, i32
  }
  func.func @transform_4(%arg0: i32, %arg1: memref<16xi32, #tpu.memory_space<smem>>, %arg2: memref<16xi32, #tpu.memory_space<smem>>) -> (i32, i32) {
    %c0_i32 = arith.constant 0 : i32
    %c0_i32_0 = arith.constant 0 : i32
    return %arg0, %c0_i32 : i32, i32
  }
}

</mosaic_0001>

<bundles_post_ra>
// kernel: bert_embeddings_without_layernorm.1
= control target key start
LH: loop header
LB: loop body
LE: loop exit
PB: predicated region body
PF: predicated region fallthrough
CT: control target
= control target key end

     0   :  { %s1464_s0 = inlined_call_operand.vmem [shape: s32[16], index: 0, kind: input, shape index: {}]   ;;  %s1465_s2 = inlined_call_operand.vmem [shape: s32[16,1], index: 2, kind: input, shape index: {}]   ;;  %s1466_s3 = inlined_call_operand.vmem [shape: f32[2,128], index: 3, kind: input, shape index: {}]   ;;  %s1467_s4 = inlined_call_operand.vmem [shape: f32[64,128], index: 4, kind: input, shape index: {}]   ;;  %s1468_s5 = inlined_call_operand.vmem [shape: f32[16,128], index: 5, kind: input, shape index: {}]   ;;  %s1469_s6 = inlined_call_operand.vmem [shape: f32[16,128], index: 6, kind: output, shape index: {}]   ;;  %s1470_s1 = inlined_call_operand.vmem [shape: s32[16], index: 1, kind: input, shape index: {}]  }
   0x1   :  { %s11_s23 = sshll.u32 %s1464_s0, 4  ;;  %s15_s26 = sshll.u32 %s1470_s1, 4  ;;  %s12_s23 = int_to_ptr.vmem [resolvable:$true] %s11_s23  ;;  %s16_s26 = int_to_ptr.vmem [resolvable:$true] %s15_s26 }
   0x2   :  { %s1265_s27 = scalar_lea.vmem %s12_s23, 16  ;;  %p1270_p1 = scmp.lt.s32.totalorder %s12_s23, %s12_s23 }
   0x3   :  { %p1266_p0 = scmp.ne.s32.totalorder %s12_s23, %s1265_s27  ;;  %p1271_p2 = scmp.lt.s32.totalorder %s1265_s27, %s1265_s27 }
   0x5   :  { %p1272_p3 = por %p1271_p2, %p1270_p1 }
   0x7   :  { %p1273_p4 = pnand %p1272_p3, %p1266_p0 }
   0x9   :  { %1276 = shalt.err (!%p1273_p4)  }
   0xa   :  { %s1331_s28 = smov [#allocation6]   ;;  %s1277_s29 = scalar_lea.vmem %s16_s26, 16 }
   0xb   :  { %14 = dma.vmem_to_smem %s12_s23, 16, %s1331_s28, [#allocation5] }
   0xc   :  { %p1278_p5 = scmp.ne.s32.totalorder %s16_s26, %s1277_s29  ;;  %p1282_p6 = scmp.lt.s32.totalorder %s16_s26, %s16_s26 }
   0xd   :  { %p1283_p7 = scmp.lt.s32.totalorder %s1277_s29, %s1277_s29 }
   0xf   :  { %p1284_p8 = por %p1283_p7, %p1282_p6 }
  0x11   :  { %p1285_p9 = pnand %p1284_p8, %p1278_p5 }
  0x13   :  { %1288 = shalt.err (!%p1285_p9)  }
  0x14   :  { %s1332_s0 = smov [#allocation7]  }
  0x15   :  { %18 = dma.vmem_to_smem %s16_s26, 16, %s1332_s0, [#allocation5] }
  0x16   :  { %1293 = dma.done.wait [#allocation5], 32 }
  0x17   :  { %1294 = vsyncadd [#allocation5], 4294967264 }
  0x18   :  { %20 = sfence }
  0x19   :  { %s1376_s1 = smov 0  }
  0x1a LB: > { %s1236_s30 = sadd.s32 4294967295, %s1329_s1   ;;  %p1240_p10 = scmp.ge.s32.totalorder %s1329_s1, 1  ;;  %s1329_s1 = sphi %s1376_s1, %s26_s1  }
  0x1b   : > { %p125_p11 = scmp.lt.s32.totalorder %s1329_s1, 3 }
  0x1d   : > { %p126_p12 = pnand %p1240_p10, %p125_p11 }
  0x1e   : > { %p145_p13 = scmp.lt.s32.totalorder (!%p126_p12), %s1236_s30, 1  ;;  %s1384_s7 = sshll.u32 (!%p126_p12), %s1236_s30, 3 }
  0x1f   : > { %129 = sbr.rel (%p126_p12) target bundleno = 307 (0x133), region = 28  ;;  %s154_s8 = sld [smem:[#allocation6 + %s1384_s7]] (!%p126_p12) }
  0x20   : > { %s155_s9 = sld [smem:[#allocation7 + %s1384_s7]] (!%p126_p12) }
  0x25   : > { %s156_s19 = scalar_lea.vmem (!%p126_p12), %s1467_s4, %s154_s8 }
  0x26   : > { %s1472_s30 = smov (!%p145_p13, %s1236_s30), 1  ;;  %v174_v0 = vld [vmem:[%s156_s19] sm:$0x1] }
  0x27   : > { %s1241_s10 = sshll.u32 %s1472_s30, 3  ;;  %175 = vst [vmem:[#allocation2] sm:$0x1] %v174_v0 }
  0x28   : > { %s1391_s13 = scalar_lea.vmem %s1465_s2, %s1241_s10  ;;  %s1396_s16 = scalar_lea.vmem %s1469_s6, %s1241_s10 }
  0x29   : > { %200 = vsyncadd [#allocation4], 16  ;;  %s201_s22 = scalar_lea.vmem %s1468_s5, %s155_s9 }
  0x2a   : > { %v220_v1 = vld [vmem:[%s201_s22] sm:$0x1] }
  0x2b   : > { %221 = vst [vmem:[#allocation3] sm:$0x1] %v220_v1 }
  0x2c   : > { %246 = vsyncadd [#allocation4 + $0x1], 16  ;;  %s247_s23 = sadd.s32 1, %s1384_s7 }
  0x2d   : > { %s248_s24 = sld [smem:[#allocation6 + %s247_s23]] }
  0x2e   : > { %s249_s25 = sld [smem:[#allocation7 + %s247_s23]] }
  0x33   : > { %s250_s28 = scalar_lea.vmem %s1467_s4, %s248_s24 }
  0x34   : > { %v269_v2 = vld [vmem:[%s250_s28] sm:$0x1] }
  0x35   : > { %270 = vst [vmem:[#allocation2 + $0x1] sm:$0x1] %v269_v2 }
  0x36   : > { %295 = vsyncadd [#allocation4], 16  ;;  %s296_s30 = scalar_lea.vmem %s1468_s5, %s249_s25 }
  0x37   : > { %v315_v3 = vld [vmem:[%s296_s30] sm:$0x1] }
  0x38   : > { %316 = vst [vmem:[#allocation3 + $0x1] sm:$0x1] %v315_v3 }
  0x39   : > { %341 = vsyncadd [#allocation4 + $0x1], 16  ;;  %s342_s8 = sadd.s32 2, %s1384_s7 }
  0x3a   : > { %s343_s9 = sld [smem:[#allocation6 + %s342_s8]] }
  0x3b   : > { %s344_s10 = sld [smem:[#allocation7 + %s342_s8]] }
  0x40   : > { %s345_s14 = scalar_lea.vmem %s1467_s4, %s343_s9 }
  0x41   : > { %v364_v4 = vld [vmem:[%s345_s14] sm:$0x1] }
  0x42   : > { %365 = vst [vmem:[#allocation2 + $0x2] sm:$0x1] %v364_v4 }
  0x43   : > { %390 = vsyncadd [#allocation4], 16  ;;  %s391_s18 = scalar_lea.vmem %s1468_s5, %s344_s10 }
  0x44   : > { %v410_v5 = vld [vmem:[%s391_s18] sm:$0x1] }
  0x45   : > { %411 = vst [vmem:[#allocation3 + $0x2] sm:$0x1] %v410_v5 }
  0x46   : > { %436 = vsyncadd [#allocation4 + $0x1], 16  ;;  %s437_s19 = sadd.s32 3, %s1384_s7 }
  0x47   : > { %s438_s20 = sld [smem:[#allocation6 + %s437_s19]] }
  0x48   : > { %s439_s21 = sld [smem:[#allocation7 + %s437_s19]] }
  0x4d   : > { %s440_s24 = scalar_lea.vmem %s1467_s4, %s438_s20 }
  0x4e   : > { %v459_v6 = vld [vmem:[%s440_s24] sm:$0x1] }
  0x4f   : > { %460 = vst [vmem:[#allocation2 + $0x3] sm:$0x1] %v459_v6 }
  0x50   : > { %485 = vsyncadd [#allocation4], 16  ;;  %s486_s27 = scalar_lea.vmem %s1468_s5, %s439_s21 }
  0x51   : > { %v505_v7 = vld [vmem:[%s486_s27] sm:$0x1] }
  0x52   : > { %506 = vst [vmem:[#allocation3 + $0x3] sm:$0x1] %v505_v7 }
  0x53   : > { %531 = vsyncadd [#allocation4 + $0x1], 16  ;;  %s532_s28 = sadd.s32 4, %s1384_s7 }
  0x54   : > { %s533_s29 = sld [smem:[#allocation6 + %s532_s28]] }
  0x55   : > { %s534_s0 = sld [smem:[#allocation7 + %s532_s28]] }
  0x5a   : > { %s535_s9 = scalar_lea.vmem %s1467_s4, %s533_s29 }
  0x5b   : > { %v554_v8 = vld [vmem:[%s535_s9] sm:$0x1] }
  0x5c   : > { %555 = vst [vmem:[#allocation2 + $0x4] sm:$0x1] %v554_v8 }
  0x5d   : > { %580 = vsyncadd [#allocation4], 16  ;;  %s581_s12 = scalar_lea.vmem %s1468_s5, %s534_s0 }
  0x5e   : > { %v600_v9 = vld [vmem:[%s581_s12] sm:$0x1] }
  0x5f   : > { %601 = vst [vmem:[#allocation3 + $0x4] sm:$0x1] %v600_v9 }
  0x60   : > { %626 = vsyncadd [#allocation4 + $0x1], 16  ;;  %s627_s14 = sadd.s32 5, %s1384_s7 }
  0x61   : > { %s628_s15 = sld [smem:[#allocation6 + %s627_s14]] }
  0x62   : > { %s629_s17 = sld [smem:[#allocation7 + %s627_s14]] }
  0x67   : > { %s630_s20 = scalar_lea.vmem %s1467_s4, %s628_s15 }
  0x68   : > { %v649_v10 = vld [vmem:[%s630_s20] sm:$0x1] }
  0x69   : > { %650 = vst [vmem:[#allocation2 + $0x5] sm:$0x1] %v649_v10 }
  0x6a   : > { %675 = vsyncadd [#allocation4], 16  ;;  %s676_s23 = scalar_lea.vmem %s1468_s5, %s629_s17 }
  0x6b   : > { %v695_v11 = vld [vmem:[%s676_s23] sm:$0x1] }
  0x6c   : > { %696 = vst [vmem:[#allocation3 + $0x5] sm:$0x1] %v695_v11 }
  0x6d   : > { %721 = vsyncadd [#allocation4 + $0x1], 16  ;;  %s722_s24 = sadd.s32 6, %s1384_s7 }
  0x6e   : > { %s723_s25 = sld [smem:[#allocation6 + %s722_s24]] }
  0x6f   : > { %s724_s26 = sld [smem:[#allocation7 + %s722_s24]] }
  0x74   : > { %s725_s29 = scalar_lea.vmem %s1467_s4, %s723_s25 }
  0x75   : > { %v744_v12 = vld [vmem:[%s725_s29] sm:$0x1] }
  0x76   : > { %745 = vst [vmem:[#allocation2 + $0x6] sm:$0x1] %v744_v12 }
  0x77   : > { %770 = vsyncadd [#allocation4], 16  ;;  %s771_s8 = scalar_lea.vmem %s1468_s5, %s724_s26 }
  0x78   : > { %v790_v13 = vld [vmem:[%s771_s8] sm:$0x1] }
  0x79   : > { %791 = vst [vmem:[#allocation3 + $0x6] sm:$0x1] %v790_v13 }
  0x7a   : > { %816 = vsyncadd [#allocation4 + $0x1], 16  ;;  %s817_s9 = sadd.s32 7, %s1384_s7 }
  0x7b   : > { %s818_s10 = sld [smem:[#allocation6 + %s817_s9]] }
  0x7c   : > { %s819_s11 = sld [smem:[#allocation7 + %s817_s9]] }
  0x81   : > { %s820_s15 = scalar_lea.vmem %s1467_s4, %s818_s10 }
  0x82   : > { %v839_v14 = vld [vmem:[%s820_s15] sm:$0x1] }
  0x83   : > { %840 = vst [vmem:[#allocation2 + $0x7] sm:$0x1] %v839_v14 }
  0x84   : > { %865 = vsyncadd [#allocation4], 16  ;;  %s866_s19 = scalar_lea.vmem %s1468_s5, %s819_s11 }
  0x85   : > { %v885_v15 = vld [vmem:[%s866_s19] sm:$0x1] }
  0x86   : > { %886 = vst [vmem:[#allocation3 + $0x7] sm:$0x1] %v885_v15 }
  0x87   : > { %911 = vsyncadd [#allocation4 + $0x1], 16 }
  0x88   : > { %1295 = dma.done.wait [#allocation4], 16 }
  0x89   : > { %1296 = vsyncadd [#allocation4], 4294967280 }
  0x8a   : > { %1297 = dma.done.wait [#allocation4 + $0x1], 16 }
  0x8b   : > { %1298 = vsyncadd [#allocation4 + $0x1], 4294967280 }
  0x8c   : > { %1299 = dma.done.wait [#allocation4], 16 }
  0x8d   : > { %1300 = vsyncadd [#allocation4], 4294967280 }
  0x8e   : > { %1301 = dma.done.wait [#allocation4 + $0x1], 16 }
  0x8f   : > { %1302 = vsyncadd [#allocation4 + $0x1], 4294967280 }
  0x90   : > { %1303 = dma.done.wait [#allocation4], 16 }
  0x91   : > { %1304 = vsyncadd [#allocation4], 4294967280 }
  0x92   : > { %1305 = dma.done.wait [#allocation4 + $0x1], 16 }
  0x93   : > { %1306 = vsyncadd [#allocation4 + $0x1], 4294967280 }
  0x94   : > { %1307 = dma.done.wait [#allocation4], 16 }
  0x95   : > { %1308 = vsyncadd [#allocation4], 4294967280 }
  0x96   : > { %1309 = dma.done.wait [#allocation4 + $0x1], 16 }
  0x97   : > { %1310 = vsyncadd [#allocation4 + $0x1], 4294967280 }
  0x98   : > { %1311 = dma.done.wait [#allocation4], 16 }
  0x99   : > { %1312 = vsyncadd [#allocation4], 4294967280 }
  0x9a   : > { %1313 = dma.done.wait [#allocation4 + $0x1], 16 }
  0x9b   : > { %1314 = vsyncadd [#allocation4 + $0x1], 4294967280 }
  0x9c   : > { %1315 = dma.done.wait [#allocation4], 16 }
  0x9d   : > { %1316 = vsyncadd [#allocation4], 4294967280 }
  0x9e   : > { %1317 = dma.done.wait [#allocation4 + $0x1], 16 }
  0x9f   : > { %1318 = vsyncadd [#allocation4 + $0x1], 4294967280 }
  0xa0   : > { %1319 = dma.done.wait [#allocation4], 16 }
  0xa1   : > { %1320 = vsyncadd [#allocation4], 4294967280 }
  0xa2   : > { %1321 = dma.done.wait [#allocation4 + $0x1], 16 }
  0xa3   : > { %1322 = vsyncadd [#allocation4 + $0x1], 4294967280 }
  0xa4   : > { %1323 = dma.done.wait [#allocation4], 16 }
  0xa5   : > { %1324 = vsyncadd [#allocation4], 4294967280 }
  0xa6   : > { %1325 = dma.done.wait [#allocation4 + $0x1], 16 }
  0xa7   : > { %1326 = vsyncadd [#allocation4 + $0x1], 4294967280  ;;  %v1333_v16 = vmov 0   ;;  %v948_v17 = vld [vmem:[%s1391_s13] sm:$0xff]  ;;  %v1334_v18 = vmov 0.0   ;;  %v946_v23 = vld [vmem:[#allocation3] sm:$0xff] }
  0xa8   : > { %1264 = vset.pattern.permute.xlu0 %v1333_v16  ;;  %vm950_vm0 = vcmp.eq.s32.totalorder %v948_v17, 0  ;;  %vm965_vm1 = vcmp.eq.s32.totalorder %v948_v17, 1  ;;  %v1245_v21 = vld [vmem:[%s1466_s3] ss:$0 sm:$0xff]  ;;  %v1247_v27 = vld [vmem:[%s1466_s3 + $0x1] ss:$0 sm:$0xff] }
  0xa9   : > { %v1244_v19 = vsel %vm950_vm0, 1.0, %v1334_v18  ;;  %v1246_v20 = vsel %vm965_vm1, 1.0, %v1334_v18  ;;  %v945_v22 = vld [vmem:[#allocation2] sm:$0xff] }
  0xaa   : > { %955 = vperm.xlu0 %1264, %v1244_v19   ;;  %v947_v25 = vadd.f32 %v946_v23, %v945_v22 }
  0xae   : > { %970 = vperm.xlu0 %1264, %v1246_v20  }
 0x129   : > { %v956_v24 = vpop.permute.xlu0 %955 }
 0x12a   : > { %v962_v26 = vmul.f32 %v1245_v21, %v956_v24 }
 0x12c   : > { %v963_v29 = vadd.f32 %v962_v26, %v947_v25 }
 0x12d   : > { %v971_v28 = vpop.permute.xlu0 %970 }
 0x12e   : > { %v977_v30 = vmul.f32 %v1247_v27, %v971_v28 }
 0x130   : > { %v978_v31 = vadd.f32 %v977_v30, %v963_v29 }
 0x132   : > { %979 = vst [vmem:[%s1396_s16] sm:$0xff] %v978_v31 }
 0x133 PF: > { %s26_s1 = sadd.s32 1, %s1329_s1  }
 0x134   : > { %p23_p0 = scmp.ge.s32.totalorder %s26_s1, 4  }
 0x136   :  { %25 = sbr.rel (!%p23_p0) target bundleno = 26 (0x1a), region = 730 }
 0x13d   :  { %999 = vsyncmov [#allocation4] }
 0x140   :  { %s1000_s13 = vpop.sfrf %999 }
 0x141   :  { %p1250_p1 = scmp.ne.s32.totalorder %s1000_s13, 0 }
 0x143   :  { %1004 = shalt.err (%p1250_p1)  }
 0x144   :  { %1006 = vsyncmov [#allocation4 + $0x1] }
 0x147   :  { %s1007_s23 = vpop.sfrf %1006 }
 0x148   :  { %p1251_p2 = scmp.ne.s32.totalorder %s1007_s23, 0 }
 0x14a   :  { %1011 = shalt.err (%p1251_p2)  }

</bundles_post_ra>
